<compile_context>
chip_gen: v7x
topology: tpu7x:2x2x1
jax: 0.10.0
libtpu: 0.0.40
codegen_flags: <defaults>
</compile_context>

<pallas_src>
import math

import jax
import jax.numpy as jnp
import numpy as np
from jax import lax
from jax.experimental import pallas as pl
from jax.experimental.pallas import tpu as pltpu

INPUT = 4        # LSTM input size
IN2 = 2 * INPUT  # fused [x(t) | x(T-1-t)] feature width (8)
HID = 32         # LSTM hidden size
H2 = 2 * HID     # bidirectional concat width (64)
G4 = 4 * HID     # per-direction gate width (128)
G8 = 8 * HID     # fused (both-direction) gate width (256)
SIG = 6 * HID    # sigmoid-gate region width (i, f, o for both directions) = 192


def encoder_kernel(x_ref, wih_ref, whh_ref, b_ref, wht_ref,
                   out_ref, feat_ref, hfin_ref, cfin_ref):
    """Fused bidirectional LSTM recurrence + W_h projection, all in VMEM.

    x_ref:    (T*B, 2I)  time-major rows of [x(t) | x(T-1-t)]
    wih_ref:  (2I, 8H)   block input->gate weights, cols [i_f,i_b,f_f,f_b,o_f,o_b,g_f,g_b]
                         (g columns pre-scaled by 2 for the tanh-via-sigmoid trick)
    whh_ref:  (2H, 8H)   block-diagonal recurrent weights (rows 0:H fwd, H:2H bwd)
    b_ref:    (1, 8H)    fused bias (= b_ih + b_hh per direction, g cols pre-scaled)
    wht_ref:  (2H, 2H)   W_h.weight.T
    out_ref:  (T, B, 2H) encoder outputs, time-major, fwd|bwd fused (output)
    feat_ref: (T*B, 2H)  W_h(encoder_outputs), time-major rows (output)
    hfin_ref: (B, 2H)    final hidden [h_fwd | h_bwd] (output)
    cfin_ref: (B, 2H)    final cell   [c_fwd | c_bwd] (output)
    """
    T, B, _ = out_ref.shape

    # ---- hoisted input->gate projection (both directions, all timesteps) ----
    xg = jnp.dot(x_ref[...], wih_ref[...],
                 preferred_element_type=jnp.float32) + b_ref[...]   # (T*B, 8H)
    xg3 = xg.reshape(T, B, G8)

    whh = whh_ref[...]  # (2H, 8H)

    # ---- fused bidirectional recurrence: carries only, no stores in the loop ----
    h = jnp.zeros((B, H2), jnp.float32)  # [h_fwd | h_bwd]
    c = jnp.zeros((B, H2), jnp.float32)  # [c_fwd | c_bwd]
    hs = []
    for s in range(T):  # fully unrolled, static s
        gates = xg3[s] + jnp.dot(h, whh, preferred_element_type=jnp.float32)  # (B, 8H)
        sig = jax.nn.sigmoid(gates)              # one EUP pass over all 256 cols
        i_g = sig[:, 0:H2]                       # [i_f, i_b]
        f_g = sig[:, H2:2 * H2]                  # [f_f, f_b]
        o_g = sig[:, 2 * H2:3 * H2]              # [o_f, o_b]
        g_g = sig[:, SIG:] * 2.0 - 1.0           # tanh(x) = 2*sigmoid(2x) - 1
        c = f_g * c + i_g * g_g
        h = o_g * jnp.tanh(c)
        hs.append(h)                             # hs[s] = [h_f(s) | h_b(T-1-s)]

    # ---- epilogue: lane-dense 64-wide trace writes + W_h projection ----
    fwd_mask = lax.broadcasted_iota(jnp.int32, (1, H2), 1) < HID
    for t in range(T):
        # out[t] = [h_f(t) | h_b(t)]; backward half comes from step T-1-t.
        out_ref[t] = jnp.where(fwd_mask, hs[t], hs[T - 1 - t])

    feat_ref[...] = jnp.dot(out_ref[...].reshape(T * B, H2), wht_ref[...],
                            preferred_element_type=jnp.float32)

    hfin_ref[...] = h
    cfin_ref[...] = c


def prepare_fused_params(params):
    """Build the fused / block-structured weight layout used by the kernel.

    Natural params (PyTorch gate order i,f,g,o along 4H), stored transposed:
      wih: (I, 4H), whh: (H, 4H), b: (1, 4H) per direction; wht: (2H, 2H) = W_h.T
    Fused column layout (chunks of width HID):
      [i_f, i_b, f_f, f_b, o_f, o_b, g_f, g_b]
    The g columns (and g bias) are pre-scaled by 2 so the kernel can compute
    tanh(x) as 2*sigmoid(2x) - 1 with a single sigmoid over all gate columns.
    """
    wih_f, whh_f, b_f, wih_b, whh_b, b_b, wht = params

    def split4(w):  # (*, 4H) in (i, f, g, o) order
        return (w[:, 0 * HID:1 * HID], w[:, 1 * HID:2 * HID],
                w[:, 2 * HID:3 * HID], w[:, 3 * HID:4 * HID])

    # input->gate block: rows 0:I act on x(t), rows I:2I act on x(T-1-t)
    i_f, f_f, g_f, o_f = split4(wih_f)
    i_b, f_b, g_b, o_b = split4(wih_b)
    ZI = jnp.zeros((INPUT, HID), jnp.float32)
    fx = lambda cmat: jnp.concatenate([cmat, ZI], axis=0)
    bx = lambda cmat: jnp.concatenate([ZI, cmat], axis=0)
    wih_blk = jnp.concatenate(
        [fx(i_f), bx(i_b), fx(f_f), bx(f_b), fx(o_f), bx(o_b),
         fx(2.0 * g_f), bx(2.0 * g_b)], axis=1)                      # (2I, 8H)

    bi_f, bf_f, bg_f, bo_f = split4(b_f)
    bi_b, bf_b, bg_b, bo_b = split4(b_b)
    b_fused = jnp.concatenate(
        [bi_f, bi_b, bf_f, bf_b, bo_f, bo_b,
         2.0 * bg_f, 2.0 * bg_b], axis=1)                            # (1, 8H)

    # recurrent block-diagonal: rows 0:H act on h_fwd, rows H:2H on h_bwd
    ri_f, rf_f, rg_f, ro_f = split4(whh_f)
    ri_b, rf_b, rg_b, ro_b = split4(whh_b)
    ZH = jnp.zeros((HID, HID), jnp.float32)
    fh = lambda cmat: jnp.concatenate([cmat, ZH], axis=0)
    bh = lambda cmat: jnp.concatenate([ZH, cmat], axis=0)
    whh_blk = jnp.concatenate(
        [fh(ri_f), bh(ri_b), fh(rf_f), bh(rf_b), fh(ro_f), bh(ro_b),
         fh(2.0 * rg_f), bh(2.0 * rg_b)], axis=1)                    # (2H, 8H)

    return wih_blk, whh_blk, b_fused, wht


def make_encoder_forward(params):
    """Fuse parameters once and return a jitted forward(x) closure."""
    wih_blk, whh_blk, b_fused, wht = prepare_fused_params(params)

    @jax.jit
    def forward(x):
        """x: (B, T, I) float32 (batch_first, like the PyTorch module)."""
        B, T, _ = x.shape
        x_tm = jnp.transpose(x, (1, 0, 2))                         # (T, B, I)
        # fused [x(t) | x(T-1-t)] rows: the kernel never reverses time itself
        x_cat = jnp.concatenate([x_tm, x_tm[::-1]], axis=-1)       # (T, B, 2I)
        x_cat = x_cat.reshape(T * B, IN2)

        inputs = (x_cat, wih_blk, whh_blk, b_fused, wht)
        out_shapes = (
            jax.ShapeDtypeStruct((T, B, H2), jnp.float32),   # encoder outputs (time-major)
            jax.ShapeDtypeStruct((T * B, H2), jnp.float32),  # W_h(outputs), time-major rows
            jax.ShapeDtypeStruct((B, H2), jnp.float32),      # final [h_fwd | h_bwd]
            jax.ShapeDtypeStruct((B, H2), jnp.float32),      # final [c_fwd | c_bwd]
        )

        def full_spec(shape):
            nd = len(shape)
            return pl.BlockSpec(shape, lambda *_: (0,) * nd)

        out_tm, feat_tm, hfin, cfin = pl.pallas_call(
            encoder_kernel,
            grid=(1,),
            in_specs=[full_spec(a.shape) for a in inputs],
            out_specs=tuple(full_spec(s.shape) for s in out_shapes),
            out_shape=out_shapes,
            compiler_params=pltpu.CompilerParams(
                dimension_semantics=("arbitrary",)),
        )(*inputs)

        # back to PyTorch batch-first conventions (fused into this jit)
        encoder_outputs = jnp.transpose(out_tm, (1, 0, 2))                     # (B, T, 2H)
        encoder_feature = (feat_tm.reshape(T, B, H2)
                           .transpose(1, 0, 2)
                           .reshape(B * T, H2))                                # (B*T, 2H)
        hn = jnp.stack([hfin[:, :HID], hfin[:, HID:]], axis=0)                 # (2, B, H)
        cn = jnp.stack([cfin[:, :HID], cfin[:, HID:]], axis=0)                 # (2, B, H)
        return encoder_outputs, encoder_feature, (hn, cn)

    return forward


def init_params(key):
    """Deterministic synthetic parameters (PyTorch-style uniform init ranges).

    Weights are stored transposed vs. PyTorch (right-multiply layout):
      wih: (I, 4H), whh: (H, 4H), b: (1, 4H) (= b_ih + b_hh), wht: (2H, 2H) = W_h.T
    Gate order along the 4H axis is PyTorch's (i, f, g, o).
    """
    k = 1.0 / math.sqrt(HID)
    keys = jax.random.split(key, 9)
    u = lambda kk, shape, a: jax.random.uniform(kk, shape, jnp.float32, -a, a)
    wih_f = u(keys[0], (INPUT, G4), k)
    whh_f = u(keys[1], (HID, G4), k)
    b_f = u(keys[2], (1, G4), k) + u(keys[3], (1, G4), k)   # b_ih + b_hh
    wih_b = u(keys[4], (INPUT, G4), k)
    whh_b = u(keys[5], (HID, G4), k)
    b_b = u(keys[6], (1, G4), k) + u(keys[7], (1, G4), k)
    kw = 1.0 / math.sqrt(H2)
    wht = u(keys[8], (H2, H2), kw)                           # W_h.weight.T
    return (wih_f, whh_f, b_f, wih_b, whh_b, b_b, wht)


def encoder_reference(x, params):
    """Pure-JAX reference matching nn.LSTM(bidirectional) + Linear semantics."""
    (wih_f, whh_f, b_f, wih_b, whh_b, b_b, wht) = params
    B, T, _ = x.shape

    def cell(x_t, h, c, wih, whh, b):
        gates = x_t @ wih + h @ whh + b
        i = jax.nn.sigmoid(gates[:, :HID])
        f = jax.nn.sigmoid(gates[:, HID:2 * HID])
        g = jnp.tanh(gates[:, 2 * HID:3 * HID])
        o = jax.nn.sigmoid(gates[:, 3 * HID:])
        c = f * c + i * g
        h = o * jnp.tanh(c)
        return h, c

    h = jnp.zeros((B, HID), jnp.float32)
    c = jnp.zeros((B, HID), jnp.float32)
    outs_f = []
    for t in range(T):
        h, c = cell(x[:, t], h, c, wih_f, whh_f, b_f)
        outs_f.append(h)
    hn_f, cn_f = h, c

    h = jnp.zeros((B, HID), jnp.float32)
    c = jnp.zeros((B, HID), jnp.float32)
    outs_b = [None] * T
    for t in range(T - 1, -1, -1):
        h, c = cell(x[:, t], h, c, wih_b, whh_b, b_b)
        outs_b[t] = h
    hn_b, cn_b = h, c

    out = jnp.concatenate(
        [jnp.stack(outs_f, axis=1), jnp.stack(outs_b, axis=1)], axis=-1)  # (B, T, 2H)
    feat = out.reshape(-1, H2) @ wht
    hidden = (jnp.stack([hn_f, hn_b]), jnp.stack([cn_f, cn_b]))
    return out, feat, hidden


if __name__ == "__main__":
    key = jax.random.PRNGKey(0)
    pkey, xkey = jax.random.split(key)
    params = init_params(pkey)

    B, T = 2, 8
    x = jax.random.normal(xkey, (B, T, INPUT), jnp.float32)   # input_embed

    encoder_forward = make_encoder_forward(params)            # fuses params once, jitted
    enc_out, enc_feat, (hn, cn) = jax.block_until_ready(encoder_forward(x))

    # sanity check against pure-JAX reference
    ref_out, ref_feat, (ref_hn, ref_cn) = encoder_reference(x, params)
    np.testing.assert_allclose(np.asarray(enc_out), np.asarray(ref_out), atol=1e-4, rtol=1e-4)
    np.testing.assert_allclose(np.asarray(enc_feat), np.asarray(ref_feat), atol=1e-4, rtol=1e-4)
    np.testing.assert_allclose(np.asarray(hn), np.asarray(ref_hn), atol=1e-4, rtol=1e-4)
    np.testing.assert_allclose(np.asarray(cn), np.asarray(ref_cn), atol=1e-4, rtol=1e-4)

    assert enc_out.shape == (B, T, H2)
    assert enc_feat.shape == (B * T, H2)
    assert hn.shape == (2, B, HID) and cn.shape == (2, B, HID)

    print("KERNEL_OK")
</pallas_src>

<mosaic_0001>
module attributes {stable_mosaic.version = 11 : i64} {
  func.func @encoder_kernel(%arg0: i32, %arg1: memref<16x8xf32, #tpu.memory_space<vmem>>, %arg2: memref<8x256xf32, #tpu.memory_space<vmem>>, %arg3: memref<64x256xf32, #tpu.memory_space<vmem>>, %arg4: memref<1x256xf32, #tpu.memory_space<vmem>>, %arg5: memref<64x64xf32, #tpu.memory_space<vmem>>, %arg6: memref<8x2x64xf32, #tpu.memory_space<vmem>>, %arg7: memref<16x64xf32, #tpu.memory_space<vmem>>, %arg8: memref<2x64xf32, #tpu.memory_space<vmem>>, %arg9: memref<2x64xf32, #tpu.memory_space<vmem>>) attributes {dimension_semantics = [#tpu.dimension_semantics<arbitrary>], iteration_bounds = array<i64: 1>, scalar_prefetch = 0 : i64, scratch_operands = 0 : i64, tpu.core_type = #tpu.core_type<tc>, window_params = [{pipeline_mode = #tpu.pipeline_mode<synchronous>, transform_indices = @transform_0, window_bounds = array<i64: 16, 8>}, {pipeline_mode = #tpu.pipeline_mode<synchronous>, transform_indices = @transform_1, window_bounds = array<i64: 8, 256>}, {pipeline_mode = #tpu.pipeline_mode<synchronous>, transform_indices = @transform_2, window_bounds = array<i64: 64, 256>}, {pipeline_mode = #tpu.pipeline_mode<synchronous>, transform_indices = @transform_3, window_bounds = array<i64: 1, 256>}, {pipeline_mode = #tpu.pipeline_mode<synchronous>, transform_indices = @transform_4, window_bounds = array<i64: 64, 64>}, {pipeline_mode = #tpu.pipeline_mode<synchronous>, transform_indices = @transform_5, window_bounds = array<i64: 8, 2, 64>}, {pipeline_mode = #tpu.pipeline_mode<synchronous>, transform_indices = @transform_6, window_bounds = array<i64: 16, 64>}, {pipeline_mode = #tpu.pipeline_mode<synchronous>, transform_indices = @transform_7, window_bounds = array<i64: 2, 64>}, {pipeline_mode = #tpu.pipeline_mode<synchronous>, transform_indices = @transform_8, window_bounds = array<i64: 2, 64>}]} {
    %c0 = arith.constant 0 : index
    %c0_0 = arith.constant 0 : index
    %0 = vector.load %arg1[%c0, %c0_0] : memref<16x8xf32, #tpu.memory_space<vmem>>, vector<16x8xf32>
    %c0_1 = arith.constant 0 : index
    %c0_2 = arith.constant 0 : index
    %1 = vector.load %arg2[%c0_1, %c0_2] : memref<8x256xf32, #tpu.memory_space<vmem>>, vector<8x256xf32>
    %cst = arith.constant dense<0.000000e+00> : vector<16x256xf32>
    %2 = tpu.matmul %0, %1, %cst {dimension_numbers = #tpu.dot_dimension_numbers<[1], [0], [0], [1], [0, 0, 1, 1], [], []>} : vector<16x8xf32>, vector<8x256xf32>, vector<16x256xf32> -> vector<16x256xf32>
    %c0_3 = arith.constant 0 : index
    %c0_4 = arith.constant 0 : index
    %3 = vector.load %arg4[%c0_3, %c0_4] : memref<1x256xf32, #tpu.memory_space<vmem>>, vector<1x256xf32>
    %4 = vector.broadcast %3 : vector<1x256xf32> to vector<16x256xf32>
    %5 = arith.addf %2, %4 : vector<16x256xf32>
    %6 = vector.shape_cast %5 : vector<16x256xf32> to vector<8x2x256xf32>
    %c0_5 = arith.constant 0 : index
    %c0_6 = arith.constant 0 : index
    %7 = vector.load %arg3[%c0_5, %c0_6] : memref<64x256xf32, #tpu.memory_space<vmem>>, vector<64x256xf32>
    %cst_7 = arith.constant 0.000000e+00 : f32
    %8 = vector.broadcast %cst_7 : f32 to vector<2x64xf32>
    %cst_8 = arith.constant 0.000000e+00 : f32
    %9 = vector.broadcast %cst_8 : f32 to vector<2x64xf32>
    %10 = vector.extract_strided_slice %6 {offsets = [0, 0, 0], sizes = [1, 2, 256], strides = [1, 1, 1]} : vector<8x2x256xf32> to vector<1x2x256xf32>
    %11 = vector.shape_cast %10 : vector<1x2x256xf32> to vector<2x256xf32>
    %cst_9 = arith.constant dense<0.000000e+00> : vector<2x256xf32>
    %12 = tpu.matmul %8, %7, %cst_9 {dimension_numbers = #tpu.dot_dimension_numbers<[1], [0], [0], [1], [0, 0, 1, 1], [], []>} : vector<2x64xf32>, vector<64x256xf32>, vector<2x256xf32> -> vector<2x256xf32>
    %13 = arith.addf %11, %12 : vector<2x256xf32>
    %14 = arith.negf %13 : vector<2x256xf32>
    %15 = math.exp %14 : vector<2x256xf32>
    %cst_10 = arith.constant 1.000000e+00 : f32
    %16 = vector.broadcast %cst_10 : f32 to vector<2x256xf32>
    %17 = arith.addf %16, %15 : vector<2x256xf32>
    %18 = arith.divf %16, %17 : vector<2x256xf32>
    %19 = vector.extract_strided_slice %18 {offsets = [0, 0], sizes = [2, 64], strides = [1, 1]} : vector<2x256xf32> to vector<2x64xf32>
    %20 = vector.extract_strided_slice %18 {offsets = [0, 64], sizes = [2, 64], strides = [1, 1]} : vector<2x256xf32> to vector<2x64xf32>
    %21 = vector.extract_strided_slice %18 {offsets = [0, 128], sizes = [2, 64], strides = [1, 1]} : vector<2x256xf32> to vector<2x64xf32>
    %22 = vector.extract_strided_slice %18 {offsets = [0, 192], sizes = [2, 64], strides = [1, 1]} : vector<2x256xf32> to vector<2x64xf32>
    %cst_11 = arith.constant 2.000000e+00 : f32
    %23 = vector.broadcast %cst_11 : f32 to vector<2x64xf32>
    %24 = arith.mulf %22, %23 : vector<2x64xf32>
    %cst_12 = arith.constant 1.000000e+00 : f32
    %25 = vector.broadcast %cst_12 : f32 to vector<2x64xf32>
    %26 = arith.subf %24, %25 : vector<2x64xf32>
    %27 = arith.mulf %20, %9 : vector<2x64xf32>
    %28 = arith.mulf %19, %26 : vector<2x64xf32>
    %29 = arith.addf %27, %28 : vector<2x64xf32>
    %30 = math.tanh %29 : vector<2x64xf32>
    %31 = arith.mulf %21, %30 : vector<2x64xf32>
    %32 = vector.extract_strided_slice %6 {offsets = [1, 0, 0], sizes = [1, 2, 256], strides = [1, 1, 1]} : vector<8x2x256xf32> to vector<1x2x256xf32>
    %33 = vector.shape_cast %32 : vector<1x2x256xf32> to vector<2x256xf32>
    %cst_13 = arith.constant dense<0.000000e+00> : vector<2x256xf32>
    %34 = tpu.matmul %31, %7, %cst_13 {dimension_numbers = #tpu.dot_dimension_numbers<[1], [0], [0], [1], [0, 0, 1, 1], [], []>} : vector<2x64xf32>, vector<64x256xf32>, vector<2x256xf32> -> vector<2x256xf32>
    %35 = arith.addf %33, %34 : vector<2x256xf32>
    %36 = arith.negf %35 : vector<2x256xf32>
    %37 = math.exp %36 : vector<2x256xf32>
    %cst_14 = arith.constant 1.000000e+00 : f32
    %38 = vector.broadcast %cst_14 : f32 to vector<2x256xf32>
    %39 = arith.addf %38, %37 : vector<2x256xf32>
    %40 = arith.divf %38, %39 : vector<2x256xf32>
    %41 = vector.extract_strided_slice %40 {offsets = [0, 0], sizes = [2, 64], strides = [1, 1]} : vector<2x256xf32> to vector<2x64xf32>
    %42 = vector.extract_strided_slice %40 {offsets = [0, 64], sizes = [2, 64], strides = [1, 1]} : vector<2x256xf32> to vector<2x64xf32>
    %43 = vector.extract_strided_slice %40 {offsets = [0, 128], sizes = [2, 64], strides = [1, 1]} : vector<2x256xf32> to vector<2x64xf32>
    %44 = vector.extract_strided_slice %40 {offsets = [0, 192], sizes = [2, 64], strides = [1, 1]} : vector<2x256xf32> to vector<2x64xf32>
    %cst_15 = arith.constant 2.000000e+00 : f32
    %45 = vector.broadcast %cst_15 : f32 to vector<2x64xf32>
    %46 = arith.mulf %44, %45 : vector<2x64xf32>
    %cst_16 = arith.constant 1.000000e+00 : f32
    %47 = vector.broadcast %cst_16 : f32 to vector<2x64xf32>
    %48 = arith.subf %46, %47 : vector<2x64xf32>
    %49 = arith.mulf %42, %29 : vector<2x64xf32>
    %50 = arith.mulf %41, %48 : vector<2x64xf32>
    %51 = arith.addf %49, %50 : vector<2x64xf32>
    %52 = math.tanh %51 : vector<2x64xf32>
    %53 = arith.mulf %43, %52 : vector<2x64xf32>
    %54 = vector.extract_strided_slice %6 {offsets = [2, 0, 0], sizes = [1, 2, 256], strides = [1, 1, 1]} : vector<8x2x256xf32> to vector<1x2x256xf32>
    %55 = vector.shape_cast %54 : vector<1x2x256xf32> to vector<2x256xf32>
    %cst_17 = arith.constant dense<0.000000e+00> : vector<2x256xf32>
    %56 = tpu.matmul %53, %7, %cst_17 {dimension_numbers = #tpu.dot_dimension_numbers<[1], [0], [0], [1], [0, 0, 1, 1], [], []>} : vector<2x64xf32>, vector<64x256xf32>, vector<2x256xf32> -> vector<2x256xf32>
    %57 = arith.addf %55, %56 : vector<2x256xf32>
    %58 = arith.negf %57 : vector<2x256xf32>
    %59 = math.exp %58 : vector<2x256xf32>
    %cst_18 = arith.constant 1.000000e+00 : f32
    %60 = vector.broadcast %cst_18 : f32 to vector<2x256xf32>
    %61 = arith.addf %60, %59 : vector<2x256xf32>
    %62 = arith.divf %60, %61 : vector<2x256xf32>
    %63 = vector.extract_strided_slice %62 {offsets = [0, 0], sizes = [2, 64], strides = [1, 1]} : vector<2x256xf32> to vector<2x64xf32>
    %64 = vector.extract_strided_slice %62 {offsets = [0, 64], sizes = [2, 64], strides = [1, 1]} : vector<2x256xf32> to vector<2x64xf32>
    %65 = vector.extract_strided_slice %62 {offsets = [0, 128], sizes = [2, 64], strides = [1, 1]} : vector<2x256xf32> to vector<2x64xf32>
    %66 = vector.extract_strided_slice %62 {offsets = [0, 192], sizes = [2, 64], strides = [1, 1]} : vector<2x256xf32> to vector<2x64xf32>
    %cst_19 = arith.constant 2.000000e+00 : f32
    %67 = vector.broadcast %cst_19 : f32 to vector<2x64xf32>
    %68 = arith.mulf %66, %67 : vector<2x64xf32>
    %cst_20 = arith.constant 1.000000e+00 : f32
    %69 = vector.broadcast %cst_20 : f32 to vector<2x64xf32>
    %70 = arith.subf %68, %69 : vector<2x64xf32>
    %71 = arith.mulf %64, %51 : vector<2x64xf32>
    %72 = arith.mulf %63, %70 : vector<2x64xf32>
    %73 = arith.addf %71, %72 : vector<2x64xf32>
    %74 = math.tanh %73 : vector<2x64xf32>
    %75 = arith.mulf %65, %74 : vector<2x64xf32>
    %76 = vector.extract_strided_slice %6 {offsets = [3, 0, 0], sizes = [1, 2, 256], strides = [1, 1, 1]} : vector<8x2x256xf32> to vector<1x2x256xf32>
    %77 = vector.shape_cast %76 : vector<1x2x256xf32> to vector<2x256xf32>
    %cst_21 = arith.constant dense<0.000000e+00> : vector<2x256xf32>
    %78 = tpu.matmul %75, %7, %cst_21 {dimension_numbers = #tpu.dot_dimension_numbers<[1], [0], [0], [1], [0, 0, 1, 1], [], []>} : vector<2x64xf32>, vector<64x256xf32>, vector<2x256xf32> -> vector<2x256xf32>
    %79 = arith.addf %77, %78 : vector<2x256xf32>
    %80 = arith.negf %79 : vector<2x256xf32>
    %81 = math.exp %80 : vector<2x256xf32>
    %cst_22 = arith.constant 1.000000e+00 : f32
    %82 = vector.broadcast %cst_22 : f32 to vector<2x256xf32>
    %83 = arith.addf %82, %81 : vector<2x256xf32>
    %84 = arith.divf %82, %83 : vector<2x256xf32>
    %85 = vector.extract_strided_slice %84 {offsets = [0, 0], sizes = [2, 64], strides = [1, 1]} : vector<2x256xf32> to vector<2x64xf32>
    %86 = vector.extract_strided_slice %84 {offsets = [0, 64], sizes = [2, 64], strides = [1, 1]} : vector<2x256xf32> to vector<2x64xf32>
    %87 = vector.extract_strided_slice %84 {offsets = [0, 128], sizes = [2, 64], strides = [1, 1]} : vector<2x256xf32> to vector<2x64xf32>
    %88 = vector.extract_strided_slice %84 {offsets = [0, 192], sizes = [2, 64], strides = [1, 1]} : vector<2x256xf32> to vector<2x64xf32>
    %cst_23 = arith.constant 2.000000e+00 : f32
    %89 = vector.broadcast %cst_23 : f32 to vector<2x64xf32>
    %90 = arith.mulf %88, %89 : vector<2x64xf32>
    %cst_24 = arith.constant 1.000000e+00 : f32
    %91 = vector.broadcast %cst_24 : f32 to vector<2x64xf32>
    %92 = arith.subf %90, %91 : vector<2x64xf32>
    %93 = arith.mulf %86, %73 : vector<2x64xf32>
    %94 = arith.mulf %85, %92 : vector<2x64xf32>
    %95 = arith.addf %93, %94 : vector<2x64xf32>
    %96 = math.tanh %95 : vector<2x64xf32>
    %97 = arith.mulf %87, %96 : vector<2x64xf32>
    %98 = vector.extract_strided_slice %6 {offsets = [4, 0, 0], sizes = [1, 2, 256], strides = [1, 1, 1]} : vector<8x2x256xf32> to vector<1x2x256xf32>
    %99 = vector.shape_cast %98 : vector<1x2x256xf32> to vector<2x256xf32>
    %cst_25 = arith.constant dense<0.000000e+00> : vector<2x256xf32>
    %100 = tpu.matmul %97, %7, %cst_25 {dimension_numbers = #tpu.dot_dimension_numbers<[1], [0], [0], [1], [0, 0, 1, 1], [], []>} : vector<2x64xf32>, vector<64x256xf32>, vector<2x256xf32> -> vector<2x256xf32>
    %101 = arith.addf %99, %100 : vector<2x256xf32>
    %102 = arith.negf %101 : vector<2x256xf32>
    %103 = math.exp %102 : vector<2x256xf32>
    %cst_26 = arith.constant 1.000000e+00 : f32
    %104 = vector.broadcast %cst_26 : f32 to vector<2x256xf32>
    %105 = arith.addf %104, %103 : vector<2x256xf32>
    %106 = arith.divf %104, %105 : vector<2x256xf32>
    %107 = vector.extract_strided_slice %106 {offsets = [0, 0], sizes = [2, 64], strides = [1, 1]} : vector<2x256xf32> to vector<2x64xf32>
    %108 = vector.extract_strided_slice %106 {offsets = [0, 64], sizes = [2, 64], strides = [1, 1]} : vector<2x256xf32> to vector<2x64xf32>
    %109 = vector.extract_strided_slice %106 {offsets = [0, 128], sizes = [2, 64], strides = [1, 1]} : vector<2x256xf32> to vector<2x64xf32>
    %110 = vector.extract_strided_slice %106 {offsets = [0, 192], sizes = [2, 64], strides = [1, 1]} : vector<2x256xf32> to vector<2x64xf32>
    %cst_27 = arith.constant 2.000000e+00 : f32
    %111 = vector.broadcast %cst_27 : f32 to vector<2x64xf32>
    %112 = arith.mulf %110, %111 : vector<2x64xf32>
    %cst_28 = arith.constant 1.000000e+00 : f32
    %113 = vector.broadcast %cst_28 : f32 to vector<2x64xf32>
    %114 = arith.subf %112, %113 : vector<2x64xf32>
    %115 = arith.mulf %108, %95 : vector<2x64xf32>
    %116 = arith.mulf %107, %114 : vector<2x64xf32>
    %117 = arith.addf %115, %116 : vector<2x64xf32>
    %118 = math.tanh %117 : vector<2x64xf32>
    %119 = arith.mulf %109, %118 : vector<2x64xf32>
    %120 = vector.extract_strided_slice %6 {offsets = [5, 0, 0], sizes = [1, 2, 256], strides = [1, 1, 1]} : vector<8x2x256xf32> to vector<1x2x256xf32>
    %121 = vector.shape_cast %120 : vector<1x2x256xf32> to vector<2x256xf32>
    %cst_29 = arith.constant dense<0.000000e+00> : vector<2x256xf32>
    %122 = tpu.matmul %119, %7, %cst_29 {dimension_numbers = #tpu.dot_dimension_numbers<[1], [0], [0], [1], [0, 0, 1, 1], [], []>} : vector<2x64xf32>, vector<64x256xf32>, vector<2x256xf32> -> vector<2x256xf32>
    %123 = arith.addf %121, %122 : vector<2x256xf32>
    %124 = arith.negf %123 : vector<2x256xf32>
    %125 = math.exp %124 : vector<2x256xf32>
    %cst_30 = arith.constant 1.000000e+00 : f32
    %126 = vector.broadcast %cst_30 : f32 to vector<2x256xf32>
    %127 = arith.addf %126, %125 : vector<2x256xf32>
    %128 = arith.divf %126, %127 : vector<2x256xf32>
    %129 = vector.extract_strided_slice %128 {offsets = [0, 0], sizes = [2, 64], strides = [1, 1]} : vector<2x256xf32> to vector<2x64xf32>
    %130 = vector.extract_strided_slice %128 {offsets = [0, 64], sizes = [2, 64], strides = [1, 1]} : vector<2x256xf32> to vector<2x64xf32>
    %131 = vector.extract_strided_slice %128 {offsets = [0, 128], sizes = [2, 64], strides = [1, 1]} : vector<2x256xf32> to vector<2x64xf32>
    %132 = vector.extract_strided_slice %128 {offsets = [0, 192], sizes = [2, 64], strides = [1, 1]} : vector<2x256xf32> to vector<2x64xf32>
    %cst_31 = arith.constant 2.000000e+00 : f32
    %133 = vector.broadcast %cst_31 : f32 to vector<2x64xf32>
    %134 = arith.mulf %132, %133 : vector<2x64xf32>
    %cst_32 = arith.constant 1.000000e+00 : f32
    %135 = vector.broadcast %cst_32 : f32 to vector<2x64xf32>
    %136 = arith.subf %134, %135 : vector<2x64xf32>
    %137 = arith.mulf %130, %117 : vector<2x64xf32>
    %138 = arith.mulf %129, %136 : vector<2x64xf32>
    %139 = arith.addf %137, %138 : vector<2x64xf32>
    %140 = math.tanh %139 : vector<2x64xf32>
    %141 = arith.mulf %131, %140 : vector<2x64xf32>
    %142 = vector.extract_strided_slice %6 {offsets = [6, 0, 0], sizes = [1, 2, 256], strides = [1, 1, 1]} : vector<8x2x256xf32> to vector<1x2x256xf32>
    %143 = vector.shape_cast %142 : vector<1x2x256xf32> to vector<2x256xf32>
    %cst_33 = arith.constant dense<0.000000e+00> : vector<2x256xf32>
    %144 = tpu.matmul %141, %7, %cst_33 {dimension_numbers = #tpu.dot_dimension_numbers<[1], [0], [0], [1], [0, 0, 1, 1], [], []>} : vector<2x64xf32>, vector<64x256xf32>, vector<2x256xf32> -> vector<2x256xf32>
    %145 = arith.addf %143, %144 : vector<2x256xf32>
    %146 = arith.negf %145 : vector<2x256xf32>
    %147 = math.exp %146 : vector<2x256xf32>
    %cst_34 = arith.constant 1.000000e+00 : f32
    %148 = vector.broadcast %cst_34 : f32 to vector<2x256xf32>
    %149 = arith.addf %148, %147 : vector<2x256xf32>
    %150 = arith.divf %148, %149 : vector<2x256xf32>
    %151 = vector.extract_strided_slice %150 {offsets = [0, 0], sizes = [2, 64], strides = [1, 1]} : vector<2x256xf32> to vector<2x64xf32>
    %152 = vector.extract_strided_slice %150 {offsets = [0, 64], sizes = [2, 64], strides = [1, 1]} : vector<2x256xf32> to vector<2x64xf32>
    %153 = vector.extract_strided_slice %150 {offsets = [0, 128], sizes = [2, 64], strides = [1, 1]} : vector<2x256xf32> to vector<2x64xf32>
    %154 = vector.extract_strided_slice %150 {offsets = [0, 192], sizes = [2, 64], strides = [1, 1]} : vector<2x256xf32> to vector<2x64xf32>
    %cst_35 = arith.constant 2.000000e+00 : f32
    %155 = vector.broadcast %cst_35 : f32 to vector<2x64xf32>
    %156 = arith.mulf %154, %155 : vector<2x64xf32>
    %cst_36 = arith.constant 1.000000e+00 : f32
    %157 = vector.broadcast %cst_36 : f32 to vector<2x64xf32>
    %158 = arith.subf %156, %157 : vector<2x64xf32>
    %159 = arith.mulf %152, %139 : vector<2x64xf32>
    %160 = arith.mulf %151, %158 : vector<2x64xf32>
    %161 = arith.addf %159, %160 : vector<2x64xf32>
    %162 = math.tanh %161 : vector<2x64xf32>
    %163 = arith.mulf %153, %162 : vector<2x64xf32>
    %164 = vector.extract_strided_slice %6 {offsets = [7, 0, 0], sizes = [1, 2, 256], strides = [1, 1, 1]} : vector<8x2x256xf32> to vector<1x2x256xf32>
    %165 = vector.shape_cast %164 : vector<1x2x256xf32> to vector<2x256xf32>
    %cst_37 = arith.constant dense<0.000000e+00> : vector<2x256xf32>
    %166 = tpu.matmul %163, %7, %cst_37 {dimension_numbers = #tpu.dot_dimension_numbers<[1], [0], [0], [1], [0, 0, 1, 1], [], []>} : vector<2x64xf32>, vector<64x256xf32>, vector<2x256xf32> -> vector<2x256xf32>
    %167 = arith.addf %165, %166 : vector<2x256xf32>
    %168 = arith.negf %167 : vector<2x256xf32>
    %169 = math.exp %168 : vector<2x256xf32>
    %cst_38 = arith.constant 1.000000e+00 : f32
    %170 = vector.broadcast %cst_38 : f32 to vector<2x256xf32>
    %171 = arith.addf %170, %169 : vector<2x256xf32>
    %172 = arith.divf %170, %171 : vector<2x256xf32>
    %173 = vector.extract_strided_slice %172 {offsets = [0, 0], sizes = [2, 64], strides = [1, 1]} : vector<2x256xf32> to vector<2x64xf32>
    %174 = vector.extract_strided_slice %172 {offsets = [0, 64], sizes = [2, 64], strides = [1, 1]} : vector<2x256xf32> to vector<2x64xf32>
    %175 = vector.extract_strided_slice %172 {offsets = [0, 128], sizes = [2, 64], strides = [1, 1]} : vector<2x256xf32> to vector<2x64xf32>
    %176 = vector.extract_strided_slice %172 {offsets = [0, 192], sizes = [2, 64], strides = [1, 1]} : vector<2x256xf32> to vector<2x64xf32>
    %cst_39 = arith.constant 2.000000e+00 : f32
    %177 = vector.broadcast %cst_39 : f32 to vector<2x64xf32>
    %178 = arith.mulf %176, %177 : vector<2x64xf32>
    %cst_40 = arith.constant 1.000000e+00 : f32
    %179 = vector.broadcast %cst_40 : f32 to vector<2x64xf32>
    %180 = arith.subf %178, %179 : vector<2x64xf32>
    %181 = arith.mulf %174, %161 : vector<2x64xf32>
    %182 = arith.mulf %173, %180 : vector<2x64xf32>
    %183 = arith.addf %181, %182 : vector<2x64xf32>
    %184 = math.tanh %183 : vector<2x64xf32>
    %185 = arith.mulf %175, %184 : vector<2x64xf32>
    %186 = tpu.iota {dimensions = array<i32: 1>} : vector<1x64xi32>
    %c32_i32 = arith.constant 32 : i32
    %187 = vector.broadcast %c32_i32 : i32 to vector<1x64xi32>
    %188 = arith.cmpi slt, %186, %187 : vector<1x64xi32>
    %189 = vector.shape_cast %188 : vector<1x64xi1> to vector<1x64xi1>
    %190 = vector.broadcast %189 : vector<1x64xi1> to vector<2x64xi1>
    %191 = arith.select %190, %31, %185 : vector<2x64xi1>, vector<2x64xf32>
    %c0_41 = arith.constant 0 : index
    %c0_42 = arith.constant 0 : index
    %c0_43 = arith.constant 0 : index
    %192 = vector.load %arg6[%c0_41, %c0_42, %c0_43] : memref<8x2x64xf32, #tpu.memory_space<vmem>>, vector<1x2x64xf32>
    %193 = vector.shape_cast %192 : vector<1x2x64xf32> to vector<2x64xf32>
    %194 = vector.shape_cast %191 : vector<2x64xf32> to vector<1x2x64xf32>
    tpu.vector_store %arg6[%c0_41, %c0_42, %c0_43], %194 {strides = array<i32>} : memref<8x2x64xf32, #tpu.memory_space<vmem>>, vector<1x2x64xf32>,
    %195 = vector.shape_cast %188 : vector<1x64xi1> to vector<1x64xi1>
    %196 = vector.broadcast %195 : vector<1x64xi1> to vector<2x64xi1>
    %197 = arith.select %196, %53, %163 : vector<2x64xi1>, vector<2x64xf32>
    %c1 = arith.constant 1 : index
    %c0_44 = arith.constant 0 : index
    %c0_45 = arith.constant 0 : index
    %198 = vector.load %arg6[%c1, %c0_44, %c0_45] : memref<8x2x64xf32, #tpu.memory_space<vmem>>, vector<1x2x64xf32>
    %199 = vector.shape_cast %198 : vector<1x2x64xf32> to vector<2x64xf32>
    %200 = vector.shape_cast %197 : vector<2x64xf32> to vector<1x2x64xf32>
    tpu.vector_store %arg6[%c1, %c0_44, %c0_45], %200 {strides = array<i32>} : memref<8x2x64xf32, #tpu.memory_space<vmem>>, vector<1x2x64xf32>,
    %201 = vector.shape_cast %188 : vector<1x64xi1> to vector<1x64xi1>
    %202 = vector.broadcast %201 : vector<1x64xi1> to vector<2x64xi1>
    %203 = arith.select %202, %75, %141 : vector<2x64xi1>, vector<2x64xf32>
    %c2 = arith.constant 2 : index
    %c0_46 = arith.constant 0 : index
    %c0_47 = arith.constant 0 : index
    %204 = vector.load %arg6[%c2, %c0_46, %c0_47] : memref<8x2x64xf32, #tpu.memory_space<vmem>>, vector<1x2x64xf32>
    %205 = vector.shape_cast %204 : vector<1x2x64xf32> to vector<2x64xf32>
    %206 = vector.shape_cast %203 : vector<2x64xf32> to vector<1x2x64xf32>
    tpu.vector_store %arg6[%c2, %c0_46, %c0_47], %206 {strides = array<i32>} : memref<8x2x64xf32, #tpu.memory_space<vmem>>, vector<1x2x64xf32>,
    %207 = vector.shape_cast %188 : vector<1x64xi1> to vector<1x64xi1>
    %208 = vector.broadcast %207 : vector<1x64xi1> to vector<2x64xi1>
    %209 = arith.select %208, %97, %119 : vector<2x64xi1>, vector<2x64xf32>
    %c3 = arith.constant 3 : index
    %c0_48 = arith.constant 0 : index
    %c0_49 = arith.constant 0 : index
    %210 = vector.load %arg6[%c3, %c0_48, %c0_49] : memref<8x2x64xf32, #tpu.memory_space<vmem>>, vector<1x2x64xf32>
    %211 = vector.shape_cast %210 : vector<1x2x64xf32> to vector<2x64xf32>
    %212 = vector.shape_cast %209 : vector<2x64xf32> to vector<1x2x64xf32>
    tpu.vector_store %arg6[%c3, %c0_48, %c0_49], %212 {strides = array<i32>} : memref<8x2x64xf32, #tpu.memory_space<vmem>>, vector<1x2x64xf32>,
    %213 = vector.shape_cast %188 : vector<1x64xi1> to vector<1x64xi1>
    %214 = vector.broadcast %213 : vector<1x64xi1> to vector<2x64xi1>
    %215 = arith.select %214, %119, %97 : vector<2x64xi1>, vector<2x64xf32>
    %c4 = arith.constant 4 : index
    %c0_50 = arith.constant 0 : index
    %c0_51 = arith.constant 0 : index
    %216 = vector.load %arg6[%c4, %c0_50, %c0_51] : memref<8x2x64xf32, #tpu.memory_space<vmem>>, vector<1x2x64xf32>
    %217 = vector.shape_cast %216 : vector<1x2x64xf32> to vector<2x64xf32>
    %218 = vector.shape_cast %215 : vector<2x64xf32> to vector<1x2x64xf32>
    tpu.vector_store %arg6[%c4, %c0_50, %c0_51], %218 {strides = array<i32>} : memref<8x2x64xf32, #tpu.memory_space<vmem>>, vector<1x2x64xf32>,
    %219 = vector.shape_cast %188 : vector<1x64xi1> to vector<1x64xi1>
    %220 = vector.broadcast %219 : vector<1x64xi1> to vector<2x64xi1>
    %221 = arith.select %220, %141, %75 : vector<2x64xi1>, vector<2x64xf32>
    %c5 = arith.constant 5 : index
    %c0_52 = arith.constant 0 : index
    %c0_53 = arith.constant 0 : index
    %222 = vector.load %arg6[%c5, %c0_52, %c0_53] : memref<8x2x64xf32, #tpu.memory_space<vmem>>, vector<1x2x64xf32>
    %223 = vector.shape_cast %222 : vector<1x2x64xf32> to vector<2x64xf32>
    %224 = vector.shape_cast %221 : vector<2x64xf32> to vector<1x2x64xf32>
    tpu.vector_store %arg6[%c5, %c0_52, %c0_53], %224 {strides = array<i32>} : memref<8x2x64xf32, #tpu.memory_space<vmem>>, vector<1x2x64xf32>,
    %225 = vector.shape_cast %188 : vector<1x64xi1> to vector<1x64xi1>
    %226 = vector.broadcast %225 : vector<1x64xi1> to vector<2x64xi1>
    %227 = arith.select %226, %163, %53 : vector<2x64xi1>, vector<2x64xf32>
    %c6 = arith.constant 6 : index
    %c0_54 = arith.constant 0 : index
    %c0_55 = arith.constant 0 : index
    %228 = vector.load %arg6[%c6, %c0_54, %c0_55] : memref<8x2x64xf32, #tpu.memory_space<vmem>>, vector<1x2x64xf32>
    %229 = vector.shape_cast %228 : vector<1x2x64xf32> to vector<2x64xf32>
    %230 = vector.shape_cast %227 : vector<2x64xf32> to vector<1x2x64xf32>
    tpu.vector_store %arg6[%c6, %c0_54, %c0_55], %230 {strides = array<i32>} : memref<8x2x64xf32, #tpu.memory_space<vmem>>, vector<1x2x64xf32>,
    %231 = vector.shape_cast %188 : vector<1x64xi1> to vector<1x64xi1>
    %232 = vector.broadcast %231 : vector<1x64xi1> to vector<2x64xi1>
    %233 = arith.select %232, %185, %31 : vector<2x64xi1>, vector<2x64xf32>
    %c7 = arith.constant 7 : index
    %c0_56 = arith.constant 0 : index
    %c0_57 = arith.constant 0 : index
    %234 = vector.load %arg6[%c7, %c0_56, %c0_57] : memref<8x2x64xf32, #tpu.memory_space<vmem>>, vector<1x2x64xf32>
    %235 = vector.shape_cast %234 : vector<1x2x64xf32> to vector<2x64xf32>
    %236 = vector.shape_cast %233 : vector<2x64xf32> to vector<1x2x64xf32>
    tpu.vector_store %arg6[%c7, %c0_56, %c0_57], %236 {strides = array<i32>} : memref<8x2x64xf32, #tpu.memory_space<vmem>>, vector<1x2x64xf32>,
    %c0_58 = arith.constant 0 : index
    %c0_59 = arith.constant 0 : index
    %c0_60 = arith.constant 0 : index
    %237 = vector.load %arg6[%c0_58, %c0_59, %c0_60] : memref<8x2x64xf32, #tpu.memory_space<vmem>>, vector<8x2x64xf32>
    %238 = vector.shape_cast %237 : vector<8x2x64xf32> to vector<16x64xf32>
    %c0_61 = arith.constant 0 : index
    %c0_62 = arith.constant 0 : index
    %239 = vector.load %arg5[%c0_61, %c0_62] : memref<64x64xf32, #tpu.memory_space<vmem>>, vector<64x64xf32>
    %cst_63 = arith.constant dense<0.000000e+00> : vector<16x64xf32>
    %240 = tpu.matmul %238, %239, %cst_63 {dimension_numbers = #tpu.dot_dimension_numbers<[1], [0], [0], [1], [0, 0, 1, 1], [], []>} : vector<16x64xf32>, vector<64x64xf32>, vector<16x64xf32> -> vector<16x64xf32>
    %c0_64 = arith.constant 0 : index
    %c0_65 = arith.constant 0 : index
    %241 = vector.load %arg7[%c0_64, %c0_65] : memref<16x64xf32, #tpu.memory_space<vmem>>, vector<16x64xf32>
    tpu.vector_store %arg7[%c0_64, %c0_65], %240 {strides = array<i32>} : memref<16x64xf32, #tpu.memory_space<vmem>>, vector<16x64xf32>,
    %c0_66 = arith.constant 0 : index
    %c0_67 = arith.constant 0 : index
    %242 = vector.load %arg8[%c0_66, %c0_67] : memref<2x64xf32, #tpu.memory_space<vmem>>, vector<2x64xf32>
    tpu.vector_store %arg8[%c0_66, %c0_67], %185 {strides = array<i32>} : memref<2x64xf32, #tpu.memory_space<vmem>>, vector<2x64xf32>,
    %c0_68 = arith.constant 0 : index
    %c0_69 = arith.constant 0 : index
    %243 = vector.load %arg9[%c0_68, %c0_69] : memref<2x64xf32, #tpu.memory_space<vmem>>, vector<2x64xf32>
    tpu.vector_store %arg9[%c0_68, %c0_69], %183 {strides = array<i32>} : memref<2x64xf32, #tpu.memory_space<vmem>>, vector<2x64xf32>,
    return
  }
  func.func @transform_0(%arg0: i32) -> (i32, i32) {
    %c0_i32 = arith.constant 0 : i32
    %c0_i32_0 = arith.constant 0 : i32
    %c0_i32_1 = arith.constant 0 : i32
    return %c0_i32, %c0_i32_0 : i32, i32
  }
  func.func @transform_1(%arg0: i32) -> (i32, i32) {
    %c0_i32 = arith.constant 0 : i32
    %c0_i32_0 = arith.constant 0 : i32
    %c0_i32_1 = arith.constant 0 : i32
    return %c0_i32, %c0_i32_0 : i32, i32
  }
  func.func @transform_2(%arg0: i32) -> (i32, i32) {
    %c0_i32 = arith.constant 0 : i32
    %c0_i32_0 = arith.constant 0 : i32
    %c0_i32_1 = arith.constant 0 : i32
    return %c0_i32, %c0_i32_0 : i32, i32
  }
  func.func @transform_3(%arg0: i32) -> (i32, i32) {
    %c0_i32 = arith.constant 0 : i32
    %c0_i32_0 = arith.constant 0 : i32
    %c0_i32_1 = arith.constant 0 : i32
    return %c0_i32, %c0_i32_0 : i32, i32
  }
  func.func @transform_4(%arg0: i32) -> (i32, i32) {
    %c0_i32 = arith.constant 0 : i32
    %c0_i32_0 = arith.constant 0 : i32
    %c0_i32_1 = arith.constant 0 : i32
    return %c0_i32, %c0_i32_0 : i32, i32
  }
  func.func @transform_5(%arg0: i32) -> (i32, i32, i32) {
    %c0_i32 = arith.constant 0 : i32
    %c0_i32_0 = arith.constant 0 : i32
    %c0_i32_1 = arith.constant 0 : i32
    %c0_i32_2 = arith.constant 0 : i32
    return %c0_i32, %c0_i32_0, %c0_i32_1 : i32, i32, i32
  }
  func.func @transform_6(%arg0: i32) -> (i32, i32) {
    %c0_i32 = arith.constant 0 : i32
    %c0_i32_0 = arith.constant 0 : i32
    %c0_i32_1 = arith.constant 0 : i32
    return %c0_i32, %c0_i32_0 : i32, i32
  }
  func.func @transform_7(%arg0: i32) -> (i32, i32) {
    %c0_i32 = arith.constant 0 : i32
    %c0_i32_0 = arith.constant 0 : i32
    %c0_i32_1 = arith.constant 0 : i32
    return %c0_i32, %c0_i32_0 : i32, i32
  }
  func.func @transform_8(%arg0: i32) -> (i32, i32) {
    %c0_i32 = arith.constant 0 : i32
    %c0_i32_0 = arith.constant 0 : i32
    %c0_i32_1 = arith.constant 0 : i32
    return %c0_i32, %c0_i32_0 : i32, i32
  }
}

</mosaic_0001>

<bundles_post_ra>
// kernel: forward.1
= control target key start
LH: loop header
LB: loop body
LE: loop exit
PB: predicated region body
PF: predicated region fallthrough
CT: control target
= control target key end

     0   :  { %14 = vsyncpa [#allocation3], 0  ;;  %s1598_s27 = smov [#allocation2]   ;;  %s1979_s0 = inlined_call_operand.vmem [shape: f32[16,8], index: 0, kind: input, shape index: {}]   ;;  %s1980_s1 = inlined_call_operand.vmem [shape: f32[8,256], index: 1, kind: input, shape index: {}]   ;;  %s1981_s2 = inlined_call_operand.hbm [shape: f32[64,256], index: 2, kind: input, shape index: {}]   ;;  %s1982_s3 = inlined_call_operand.vmem [shape: f32[1,256], index: 3, kind: input, shape index: {}]   ;;  %s1983_s4 = inlined_call_operand.vmem [shape: f32[64,64], index: 4, kind: input, shape index: {}]   ;;  %s1984_s5 = inlined_call_operand.vmem [shape: f32[8,2,64], index: 5, kind: output, shape index: {0}]   ;;  %s1985_s6 = inlined_call_operand.vmem [shape: f32[16,64], index: 6, kind: output, shape index: {1}]   ;;  %s1986_s7 = inlined_call_operand.vmem [shape: f32[2,64], index: 7, kind: output, shape index: {2}]   ;;  %s1987_s8 = inlined_call_operand.vmem [shape: f32[2,64], index: 8, kind: output, shape index: {3}]  }
   0x1   :  { %s24_s28 = sshll.u32 %s1598_s27, 4  ;;  %s1574_s9 = scalar_lea.hbm %s1981_s2, 2048  ;;  %s25_s28 = int_to_ptr.vmem [resolvable:$true] %s24_s28 }
   0x2   :  { %p1575_p0 = scmp.ne.s32.totalorder %s1981_s2, %s1574_s9  ;;  %p1578_p1 = scmp.lt.u32.totalorder %s1574_s9, %s1981_s2 }
   0x4   :  { %p1580_p2 = pnand %p1578_p1, %p1575_p0 }
   0x6   :  { %1583 = shalt.err (!%p1580_p2)
}
   0x7   :  { %s1584_s14 = scalar_lea.vmem %s25_s28, 2048  ;;  %p1589_p4 = scmp.lt.s32.totalorder %s25_s28, %s25_s28 }
   0x8   :  { %p1585_p3 = scmp.ne.s32.totalorder %s25_s28, %s1584_s14  ;;  %p1590_p5 = scmp.lt.s32.totalorder %s1584_s14, %s1584_s14 }
   0xa   :  { %p1591_p6 = por %p1590_p5, %p1589_p4 }
   0xc   :  { %p1592_p7 = pnand %p1591_p6, %p1585_p3 }
   0xe   :  { %1595 = shalt.err (!%p1592_p7)
}
   0xf   :  { %s1599_s15 = smov 256   ;;  %s1600_s16 = smov 16  }
  0x10   :  { %30 = dma.hbm_to_vmem [thread:$0]  %s1981_s2, 2048, %s25_s28, [#allocation3], %s1599_s15, %s1599_s15, %s1600_s16  }
  0x11   :  { %1596 = dma.done.wait [#allocation3], 2048  }
  0x12   :  { %1597 = vsyncadd [#allocation3], 4294965248  ;;  %v1601_v0 = vmov 0.0   ;;  %v187_v1 = vld [vmem:[#allocation2 + $0x8] sm:$0xff]  ;;  %v189_v2 = vld [vmem:[#allocation2 + $0x18] sm:$0xff]  ;;  %vm54_vm0 = vcmask 64512   ;;  %v44_v28 = vlaneseq }
  0x13   :  { %125 = vmatprep.mubr.f32.mxu0 %v1601_v0  ;;  %270 = vmatprep.mubr.f32.mxu1 %v1601_v0  ;;  %v186_v3 = vld [vmem:[#allocation2] sm:$0xff]  ;;  %v1663_v4 = vpack.c.bf16 %v189_v2, %v187_v1  ;;  %v188_v5 = vld [vmem:[#allocation2 + $0x10] sm:$0xff]  ;;  %v191_v6 = vld [vmem:[#allocation2 + $0x28] sm:$0xff]  ;;  %v1602_v38 = vmov 1983009808   ;;  %vm202_vm1 = vcmask 523264  }
  0x14   :  { %v193_v7 = vld [vmem:[#allocation2 + $0x38] sm:$0xff]  ;;  %v1665_v8 = vpack.c.bf16 %v188_v5, %v186_v3  ;;  %v190_v10 = vld [vmem:[#allocation2 + $0x20] sm:$0xff]  ;;  %v192_v11 = vld [vmem:[#allocation2 + $0x30] sm:$0xff]  ;;  %v45_v29 = vshrl.u32 %v44_v28, 7  ;;  %v145_v39 = vunpack.c.l.s4 %v1602_v38  ;;  %vm1121_vm3 = vcmask 517120  }
  0x15   :  { %v1667_v9 = vpack.c.bf16 %v193_v7, %v191_v6  ;;  %v195_v12 = vld [vmem:[#allocation2 + $0x48] sm:$0xff]  ;;  %1377 = vmatprep.subr.bf16.mxu1 %v1663_v4  ;;  %v197_v13 = vld [vmem:[#allocation2 + $0x58] sm:$0xff]  ;;  %v1671_v14 = vpack.c.bf16 %v192_v11, %v190_v10  ;;  %v40_v16 = vld [vmem:[%s1980_s1] sm:$0xff] }
  0x16   :  { %1379 = vmatpush1.bf16.msra.mxu1 %v1665_v8  ;;  %v41_v15 = vld [vmem:[%s1980_s1 + $0x8] sm:$0xff]  ;;  %v1680_v17 = vpack.c.bf16 %v197_v13, %v195_v12  ;;  %v194_v18 = vld [vmem:[#allocation2 + $0x40] sm:$0xff]  ;;  %v196_v19 = vld [vmem:[#allocation2 + $0x50] sm:$0xff]  ;;  %v46_v30 = vsub.s32 0, %v45_v29  ;;  %v50_v32 = vsub.s32 1, %v45_v29  ;;  %v146_v43 = vunpack.c.0.s8 %v145_v39 }
  0x17   :  { %1381 = vmatprep.subr.bf16.mxu1 %v1667_v9  ;;  %61 = vmatprep.subr.mxu0 %v41_v15  ;;  %v38_v20 = vld [vmem:[%s1979_s0] sm:$0xff]  ;;  %v199_v21 = vld [vmem:[#allocation2 + $0x68] sm:$0xff]  ;;  %v201_v22 = vld [vmem:[#allocation2 + $0x78] sm:$0xff]  ;;  %v1688_v23 = vpack.c.bf16 %v196_v19, %v194_v18 }
  0x18   :  { %62 = vmatpush1.msra.mxu0 %v40_v16  ;;  %v1692_v24 = vpack.c.bf16 %v201_v22, %v199_v21  ;;  %v198_v25 = vld [vmem:[#allocation2 + $0x60] sm:$0xff]  ;;  %v200_v26 = vld [vmem:[#allocation2 + $0x70] sm:$0xff]  ;;  %v1730_v44 = vsub.s32 %v146_v43, %v45_v29  ;;  %v39_v60 = vld [vmem:[%s1979_s0 + $0x8] sm:$0xff] }
  0x19   :  { %1313 = vmatmul.mubr.msk.f32.vlgmr.msra.gmra.mrb[0].mxu0 %vm54_vm0, %v38_v20  ;;  %1393 = vmatprep.subr.bf16.mxu0 %v1663_v4  ;;  %v1697_v27 = vpack.c.bf16 %v200_v26, %v198_v25  ;;  %v42_v31 = vld [vmem:[%s1982_s3] sm:$0x3]  ;;  %s1603_s3 = smov 64  }
  0x1a   :  { %1383 = vmatpush1.bf16.msra.mxu1 %v1671_v14  ;;  %1395 = vmatpush1.bf16.msra.mxu0 %v1665_v8  ;;  %v47_v33 = vrot.slane %v42_v31, %v46_v30  ;;  %v51_v34 = vrot.slane %v42_v31, %v50_v32 }
  0x1b   :  { %1385 = vmatprep.subr.bf16.mxu1 %v1680_v17  ;;  %1397 = vmatprep.subr.bf16.mxu0 %v1667_v9 }
  0x1c   :  { %131 = vmatprep.mubr.f32.mxu0 %v1601_v0 }
  0x1d   :  { %1314 = vmatmul.mubr.msk.f32.gmra.mrb[2].mxu0 %vm54_vm0, %v39_v60 }
  0x1e   :  { %1387 = vmatpush1.bf16.msra.mxu1 %v1688_v23  ;;  %1399 = vmatpush1.bf16.msra.mxu0 %v1671_v14 }
  0x1f   :  { %1389 = vmatprep.subr.bf16.mxu1 %v1692_v24  ;;  %1401 = vmatprep.subr.bf16.mxu0 %v1680_v17 }
  0x20   :  { %384 = vmatprep.mubr.f32.mxu0 %v1601_v0 }
  0x22   :  { %1391 = vmatpush1.bf16.msra.mxu1 %v1697_v27  ;;  %1403 = vmatpush1.bf16.msra.mxu0 %v1688_v23 }
  0x23   :  { %1405 = vmatprep.subr.bf16.mxu0 %v1692_v24  ;;  %1409 = vmatprep.subr.bf16.mxu1 %v1663_v4 }
  0x25   :  { %271 = vmatmul.mubr.f32.vlgmr.msra.gmra.mrb[0].mxu1 %v1601_v0 }
  0x26   :  { %1407 = vmatpush1.bf16.msra.mxu0 %v1697_v27  ;;  %1411 = vmatpush1.bf16.msra.mxu1 %v1665_v8 }
  0x27   :  { %1413 = vmatprep.subr.bf16.mxu1 %v1667_v9  ;;  %498 = vmatprep.mubr.f32.mxu1 %v1601_v0 }
  0x28   :  { %1425 = vmatprep.subr.bf16.mxu0 %v1663_v4 }
  0x2a   :  { %1415 = vmatpush1.bf16.msra.mxu1 %v1671_v14 }
  0x2b   :  { %1417 = vmatprep.subr.bf16.mxu1 %v1680_v17 }
  0x2e   :  { %1419 = vmatpush1.bf16.msra.mxu1 %v1688_v23 }
  0x2f   :  { %1421 = vmatprep.subr.bf16.mxu1 %v1692_v24 }
  0x32   :  { %1423 = vmatpush1.bf16.msra.mxu1 %v1697_v27 }
  0x33   :  { %1441 = vmatprep.subr.bf16.mxu1 %v1663_v4 }
  0xec   :  { %v127_v35 = vpop.f32.mrb[0].mxu0 }
  0xed   :  { %v1722_v36 = vadd.f32 %v127_v35, %v47_v33  ;;  %v129_v37 = vpop.f32.mrb[1].mxu0 }
  0xee   :  { %v1724_v40 = vadd.f32 %v129_v37, %v51_v34 }
  0xf0   :  { %v142_v41 = vcombine.low %v1722_v36, %v1724_v40  ;;  %v143_v42 = vcombine.high %v1722_v36, %v1724_v40  ;;  %v133_v2 = vpop.f32.mrb[2].mxu0 }
  0xf1   :  { %v1742_v3 = vadd.f32 %v133_v2, %v47_v33  ;;  %v135_v5 = vpop.f32.mrb[3].mxu0 }
  0xf2   :  { %v150_v47 = vrot.slane %v142_v41, %v1730_v44  ;;  %v1744_v6 = vadd.f32 %v135_v5, %v51_v34 }
  0xf4   :  { %v160_v7 = vcombine.low %v1742_v3, %v1744_v6  ;;  %v161_v10 = vcombine.high %v1742_v3, %v1744_v6  ;;  %v158_v19 = vcombine.high %v150_v47, %v150_v47 }
  0xf8   :  { %v272_v45 = vpop.f32.mrb[0].mxu1 }
  0xf9   :  { %v274_v46 = vpop.f32.mrb[1].mxu1 }
  0xfa   :  { %v279_v48 = vcombine.low %v272_v45, %v274_v46 }
  0xfc   :  { %v286_v49 = vrot.slane %v279_v48, %v1730_v44 }
  0xfe   :  { %v288_v50 = vadd.f32 %v286_v49, %v150_v47  ;;  %v157_v49 = vrot.slane %v143_v42, %v1730_v44 }
 0x100   :  { %v1315_v51 = vmul.f32 -1.442695, %v288_v50 }
 0x102   :  { %1526 = vpow2.f32 %v1315_v51 }
 0x10c   :  { %v1527_v52 = vpop.eup %1526 }
 0x10d   :  { %v292_v53 = vadd.f32 1.0, %v1527_v52 }
 0x10f   :  { %1528 = vrcp.f32 %v292_v53 }
 0x119   :  { %v1529_v54 = vpop.eup %1528 }
 0x11a   :  { %296 = vrot.lane.b32.xlu0 %v1529_v54, %s1603_s3  ;;  %v302_v61 = vmul.f32 0.0, %v1529_v54  ;;  %v310_v11 = vrot.slane %v1529_v54, 2 }
 0x18c   :  { %v297_v55 = vpop.permute.xlu0 %296 }
 0x18d   :  { %v298_v56 = vrot.slane %v297_v55, 2 }
 0x18f   :  { %v300_v57 = vmul.f32 2.0, %v298_v56 }
 0x191   :  { %v1316_v58 = vadd.f32 -1.0, %v300_v57 }
 0x193   :  { %v303_v59 = vmul.f32 %v1529_v54, %v1316_v58 }
 0x195   :  { %305 = vrot.lane.b32.xlu0 %v303_v59, %s1603_s3 }
 0x207   :  { %v306_v62 = vpop.permute.xlu0 %305 }
 0x208   :  { %v308_v63 = vadd.f32 %v306_v62, %v302_v61 }
 0x20a   :  { %1530 = vtanh.f32 %v308_v63 }
 0x214   :  { %v1531_v1 = vpop.eup %1530 }
 0x215   :  { %313 = vrot.lane.b32.xlu1 %v1531_v1, %s1603_s3 }
 0x287   :  { %v314_v12 = vpop.permute.xlu1 %313 }
 0x288   :  { %v1750_v13 = vmul.f32 %v314_v12, %v310_v11  ;;  %v159_v12 = vcombine.high %v157_v49, %v157_v49 }
 0x28a   :  { %1317 = vmatmul.mubr.msk.f32.vlgmr.msra.gmra.mrb[4].mxu0 %vm202_vm1, %v1750_v13 }
 0x28b   :  { %1427 = vmatpush1.bf16.msra.mxu0 %v1665_v8  ;;  %612 = vmatprep.mubr.f32.mxu0 %v1601_v0 }
 0x28c   :  { %1429 = vmatprep.subr.bf16.mxu0 %v1667_v9 }
 0x28f   :  { %1431 = vmatpush1.bf16.msra.mxu0 %v1671_v14 }
 0x290   :  { %1433 = vmatprep.subr.bf16.mxu0 %v1680_v17 }
 0x293   :  { %1435 = vmatpush1.bf16.msra.mxu0 %v1688_v23 }
 0x294   :  { %1437 = vmatprep.subr.bf16.mxu0 %v1692_v24 }
 0x297   :  { %1439 = vmatpush1.bf16.msra.mxu0 %v1697_v27 }
 0x298   :  { %1457 = vmatprep.subr.bf16.mxu0 %v1663_v4 }
 0x35d   :  { %v386_v15 = vpop.f32.mrb[4].mxu0 }
 0x35e   :  { %v388_v16 = vpop.f32.mrb[5].mxu0 }
 0x35f   :  { %v393_v18 = vcombine.low %v386_v15, %v388_v16 }
 0x361   :  { %v400_v20 = vrot.slane %v393_v18, %v1730_v44 }
 0x363   :  { %v402_v21 = vadd.f32 %v400_v20, %v158_v19 }
 0x365   :  { %v1318_v22 = vmul.f32 -1.442695, %v402_v21 }
 0x367   :  { %1532 = vpow2.f32 %v1318_v22 }
 0x371   :  { %v1533_v25 = vpop.eup %1532 }
 0x372   :  { %v406_v26 = vadd.f32 1.0, %v1533_v25 }
 0x374   :  { %1534 = vrcp.f32 %v406_v26 }
 0x37e   :  { %v1535_v29 = vpop.eup %1534 }
 0x37f   :  { %410 = vrot.lane.b32.xlu1 %v1535_v29, %s1603_s3  ;;  %v416_v35 = vmul.f32 %v1535_v29, %v308_v63  ;;  %v424_v41 = vrot.slane %v1535_v29, 2 }
 0x3f1   :  { %v411_v30 = vpop.permute.xlu1 %410 }
 0x3f2   :  { %v412_v31 = vrot.slane %v411_v30, 2 }
 0x3f4   :  { %v414_v32 = vmul.f32 2.0, %v412_v31 }
 0x3f6   :  { %v1319_v33 = vadd.f32 -1.0, %v414_v32 }
 0x3f8   :  { %v417_v34 = vmul.f32 %v1535_v29, %v1319_v33 }
 0x3fa   :  { %419 = vrot.lane.b32.xlu0 %v417_v34, %s1603_s3 }
 0x46c   :  { %v420_v37 = vpop.permute.xlu0 %419 }
 0x46d   :  { %v422_v38 = vadd.f32 %v420_v37, %v416_v35 }
 0x46f   :  { %1536 = vtanh.f32 %v422_v38 }
 0x479   :  { %v1537_v39 = vpop.eup %1536 }
 0x47a   :  { %427 = vrot.lane.b32.xlu1 %v1537_v39, %s1603_s3 }
 0x4ec   :  { %v428_v43 = vpop.permute.xlu1 %427 }
 0x4ed   :  { %v1767_v45 = vmul.f32 %v428_v43, %v424_v41  ;;  %v168_v43 = vrot.slane %v160_v7, %v1730_v44 }
 0x4ef   :  { %1320 = vmatmul.mubr.msk.f32.vlgmr.msra.gmra.mrb[2].mxu1 %vm202_vm1, %v1767_v45 }
 0x4f0   :  { %1443 = vmatpush1.bf16.msra.mxu1 %v1665_v8  ;;  %726 = vmatprep.mubr.f32.mxu1 %v1601_v0 }
 0x4f1   :  { %1445 = vmatprep.subr.bf16.mxu1 %v1667_v9 }
 0x4f4   :  { %1447 = vmatpush1.bf16.msra.mxu1 %v1671_v14 }
 0x4f5   :  { %1449 = vmatprep.subr.bf16.mxu1 %v1680_v17 }
 0x4f8   :  { %1451 = vmatpush1.bf16.msra.mxu1 %v1688_v23 }
 0x4f9   :  { %1453 = vmatprep.subr.bf16.mxu1 %v1692_v24 }
 0x4fc   :  { %1455 = vmatpush1.bf16.msra.mxu1 %v1697_v27 }
 0x4fd   :  { %1473 = vmatprep.subr.bf16.mxu1 %v1663_v4 }
 0x5c2   :  { %v500_v46 = vpop.f32.mrb[2].mxu1 }
 0x5c3   :  { %v502_v47 = vpop.f32.mrb[3].mxu1 }
 0x5c4   :  { %v507_v48 = vcombine.low %v500_v46, %v502_v47 }
 0x5c6   :  { %v514_v50 = vrot.slane %v507_v48, %v1730_v44 }
 0x5c8   :  { %v516_v51 = vadd.f32 %v514_v50, %v157_v49 }
 0x5ca   :  { %v1321_v52 = vmul.f32 -1.442695, %v516_v51 }
 0x5cc   :  { %1538 = vpow2.f32 %v1321_v52 }
 0x5d6   :  { %v1539_v53 = vpop.eup %1538 }
 0x5d7   :  { %v520_v54 = vadd.f32 1.0, %v1539_v53 }
 0x5d9   :  { %1540 = vrcp.f32 %v520_v54 }
 0x5e3   :  { %v1541_v55 = vpop.eup %1540 }
 0x5e4   :  { %524 = vrot.lane.b32.xlu0 %v1541_v55, %s1603_s3  ;;  %v530_v36 = vmul.f32 %v1541_v55, %v422_v38  ;;  %v538_v62 = vrot.slane %v1541_v55, 2 }
 0x656   :  { %v525_v56 = vpop.permute.xlu0 %524 }
 0x657   :  { %v526_v57 = vrot.slane %v525_v56, 2 }
 0x659   :  { %v528_v58 = vmul.f32 2.0, %v526_v57 }
 0x65b   :  { %v1322_v59 = vadd.f32 -1.0, %v528_v58 }
 0x65d   :  { %v531_v60 = vmul.f32 %v1541_v55, %v1322_v59 }
 0x65f   :  { %533 = vrot.lane.b32.xlu1 %v531_v60, %s1603_s3  ;;  %v1823_v60 = vand.u32 127, %v44_v28 }
 0x661   :  { %vm1117_vm2 = vcmp.lt.s32.totalorder %v1823_v60, 32 }
 0x6d1   :  { %v534_v40 = vpop.permute.xlu1 %533 }
 0x6d2   :  { %v536_v42 = vadd.f32 %v534_v40, %v530_v36 }
 0x6d4   :  { %1542 = vtanh.f32 %v536_v42 }
 0x6de   :  { %v1543_v61 = vpop.eup %1542 }
 0x6df   :  { %541 = vrot.lane.b32.xlu0 %v1543_v61, %s1603_s3 }
 0x751   :  { %v542_v63 = vpop.permute.xlu0 %541 }
 0x752   :  { %v1788_v1 = vmul.f32 %v542_v63, %v538_v62 }
 0x754   :  { %1323 = vmatmul.mubr.msk.f32.vlgmr.msra.gmra.mrb[6].mxu0 %vm202_vm1, %v1788_v1 }
 0x755   :  { %1459 = vmatpush1.bf16.msra.mxu0 %v1665_v8  ;;  %840 = vmatprep.mubr.f32.mxu0 %v1601_v0 }
 0x756   :  { %1461 = vmatprep.subr.bf16.mxu0 %v1667_v9 }
 0x759   :  { %1463 = vmatpush1.bf16.msra.mxu0 %v1671_v14 }
 0x75a   :  { %1465 = vmatprep.subr.bf16.mxu0 %v1680_v17 }
 0x75d   :  { %1467 = vmatpush1.bf16.msra.mxu0 %v1688_v23 }
 0x75e   :  { %1469 = vmatprep.subr.bf16.mxu0 %v1692_v24 }
 0x761   :  { %1471 = vmatpush1.bf16.msra.mxu0 %v1697_v27 }
 0x762   :  { %1489 = vmatprep.subr.bf16.mxu0 %v1663_v4 }
 0x827   :  { %v614_v2 = vpop.f32.mrb[6].mxu0 }
 0x828   :  { %v616_v5 = vpop.f32.mrb[7].mxu0 }
 0x829   :  { %v621_v11 = vcombine.low %v614_v2, %v616_v5  ;;  %v176_v5 = vcombine.high %v168_v43, %v168_v43 }
 0x82b   :  { %v628_v15 = vrot.slane %v621_v11, %v1730_v44 }
 0x82d   :  { %v630_v16 = vadd.f32 %v628_v15, %v159_v12 }
 0x82f   :  { %v1324_v18 = vmul.f32 -1.442695, %v630_v16 }
 0x831   :  { %1544 = vpow2.f32 %v1324_v18 }
 0x83b   :  { %v1545_v19 = vpop.eup %1544 }
 0x83c   :  { %v634_v20 = vadd.f32 1.0, %v1545_v19 }
 0x83e   :  { %1546 = vrcp.f32 %v634_v20 }
 0x848   :  { %v1547_v21 = vpop.eup %1546 }
 0x849   :  { %638 = vrot.lane.b32.xlu1 %v1547_v21, %s1603_s3  ;;  %v644_v30 = vmul.f32 %v1547_v21, %v536_v42  ;;  %v652_v34 = vrot.slane %v1547_v21, 2 }
 0x8bb   :  { %v639_v22 = vpop.permute.xlu1 %638 }
 0x8bc   :  { %v640_v25 = vrot.slane %v639_v22, 2 }
 0x8be   :  { %v642_v26 = vmul.f32 2.0, %v640_v25 }
 0x8c0   :  { %v1325_v29 = vadd.f32 -1.0, %v642_v26 }
 0x8c2   :  { %v645_v4 = vmul.f32 %v1547_v21, %v1325_v29 }
 0x8c4   :  { %647 = vrot.lane.b32.xlu0 %v645_v4, %s1603_s3 }
 0x936   :  { %v648_v31 = vpop.permute.xlu0 %647 }
 0x937   :  { %v650_v32 = vadd.f32 %v648_v31, %v644_v30 }
 0x939   :  { %1548 = vtanh.f32 %v650_v32 }
 0x943   :  { %v1549_v33 = vpop.eup %1548 }
 0x944   :  { %655 = vrot.lane.b32.xlu1 %v1549_v33, %s1603_s3 }
 0x9b6   :  { %v656_v35 = vpop.permute.xlu1 %655 }
 0x9b7   :  { %v658_v37 = vmul.f32 %v656_v35, %v652_v34 }
 0x9b9   :  { %1326 = vmatmul.mubr.msk.f32.vlgmr.msra.gmra.mrb[4].mxu1 %vm202_vm1, %v658_v37 }
 0x9ba   :  { %1475 = vmatpush1.bf16.msra.mxu1 %v1665_v8  ;;  %954 = vmatprep.mubr.f32.mxu1 %v1601_v0 }
 0x9bb   :  { %1477 = vmatprep.subr.bf16.mxu1 %v1667_v9 }
 0x9be   :  { %1479 = vmatpush1.bf16.msra.mxu1 %v1671_v14 }
 0x9bf   :  { %1481 = vmatprep.subr.bf16.mxu1 %v1680_v17 }
 0x9c2   :  { %1483 = vmatpush1.bf16.msra.mxu1 %v1688_v23 }
 0x9c3   :  { %1485 = vmatprep.subr.bf16.mxu1 %v1692_v24 }
 0x9c6   :  { %1487 = vmatpush1.bf16.msra.mxu1 %v1697_v27 }
 0xa8c   :  { %v728_v38 = vpop.f32.mrb[4].mxu1 }
 0xa8d   :  { %v730_v39 = vpop.f32.mrb[5].mxu1 }
 0xa8e   :  { %v735_v41 = vcombine.low %v728_v38, %v730_v39 }
 0xa90   :  { %v742_v46 = vrot.slane %v735_v41, %v1730_v44 }
 0xa92   :  { %v744_v47 = vadd.f32 %v742_v46, %v168_v43 }
 0xa94   :  { %v1327_v48 = vmul.f32 -1.442695, %v744_v47 }
 0xa96   :  { %1550 = vpow2.f32 %v1327_v48 }
 0xaa0   :  { %v1551_v49 = vpop.eup %1550 }
 0xaa1   :  { %v748_v50 = vadd.f32 1.0, %v1551_v49 }
 0xaa3   :  { %1552 = vrcp.f32 %v748_v50 }
 0xaad   :  { %v1553_v51 = vpop.eup %1552 }
 0xaae   :  { %752 = vrot.lane.b32.xlu0 %v1553_v51, %s1603_s3  ;;  %v758_v57 = vmul.f32 %v1553_v51, %v650_v32  ;;  %v766_v36 = vrot.slane %v1553_v51, 2 }
 0xb20   :  { %v753_v52 = vpop.permute.xlu0 %752 }
 0xb21   :  { %v754_v53 = vrot.slane %v753_v52, 2 }
 0xb23   :  { %v756_v54 = vmul.f32 2.0, %v754_v53 }
 0xb25   :  { %v1328_v55 = vadd.f32 -1.0, %v756_v54 }
 0xb27   :  { %v759_v56 = vmul.f32 %v1553_v51, %v1328_v55 }
 0xb29   :  { %761 = vrot.lane.b32.xlu1 %v759_v56, %s1603_s3 }
 0xb9b   :  { %v762_v7 = vpop.permute.xlu1 %761 }
 0xb9c   :  { %v764_v58 = vadd.f32 %v762_v7, %v758_v57 }
 0xb9e   :  { %1554 = vtanh.f32 %v764_v58 }
 0xba8   :  { %v1555_v59 = vpop.eup %1554 }
 0xba9   :  { %769 = vrot.lane.b32.xlu0 %v1555_v59, %s1603_s3 }
 0xc1b   :  { %v770_v40 = vpop.permute.xlu0 %769 }
 0xc1c   :  { %v772_v42 = vmul.f32 %v770_v40, %v766_v36 }
 0xc1e   :  { %v1129_v61 = vsel %vm1117_vm2, %v658_v37, %v772_v42  ;;  %v1132_v62 = vsel %vm1117_vm2, %v772_v42, %v658_v37  ;;  %1329 = vmatmul.mubr.msk.f32.vlgmr.msra.gmra.mrb[8].mxu0 %vm202_vm1, %v772_v42 }
 0xc1f   :  { %1340 = vst.msk [vmem:[%s1984_s5 + $0x6] sm:$0x3] %vm1121_vm3, %v1129_v61  ;;  %1341 = vst.msk [vmem:[%s1984_s5 + $0x8] sm:$0x3] %vm1121_vm3, %v1132_v62  ;;  %1491 = vmatpush1.bf16.msra.mxu0 %v1665_v8  ;;  %1068 = vmatprep.mubr.f32.mxu0 %v1601_v0 }
 0xc20   :  { %1493 = vmatprep.subr.bf16.mxu0 %v1667_v9 }
 0xc23   :  { %1495 = vmatpush1.bf16.msra.mxu0 %v1671_v14 }
 0xc24   :  { %1497 = vmatprep.subr.bf16.mxu0 %v1680_v17 }
 0xc27   :  { %1499 = vmatpush1.bf16.msra.mxu0 %v1688_v23 }
 0xc28   :  { %1501 = vmatprep.subr.bf16.mxu0 %v1692_v24 }
 0xc2b   :  { %1503 = vmatpush1.bf16.msra.mxu0 %v1697_v27 }
 0xcf1   :  { %v842_v28 = vpop.f32.mrb[8].mxu0 }
 0xcf2   :  { %v844_v63 = vpop.f32.mrb[9].mxu0 }
 0xcf3   :  { %v849_v2 = vcombine.low %v842_v28, %v844_v63 }
 0xcf5   :  { %v856_v8 = vrot.slane %v849_v2, %v1730_v44 }
 0xcf7   :  { %v858_v11 = vadd.f32 %v856_v8, %v176_v5  ;;  %v1152_v8 = vld [vmem:[%s1983_s4] sm:$0xff] }
 0xcf9   :  { %v1330_v0 = vmul.f32 -1.442695, %v858_v11  ;;  %v1153_v11 = vld [vmem:[%s1983_s4 + $0x8] sm:$0xff] }
 0xcfb   :  { %1556 = vpow2.f32 %v1330_v0 }
 0xd05   :  { %v1557_v9 = vpop.eup %1556 }
 0xd06   :  { %v862_v12 = vadd.f32 1.0, %v1557_v9  ;;  %v1504_v9 = vpack.c.bf16 %v1153_v11, %v1152_v8 }
 0xd08   :  { %1558 = vrcp.f32 %v862_v12  ;;  %1505 = vmatprep.subr.bf16.mxu1 %v1504_v9 }
 0xd12   :  { %v1559_v14 = vpop.eup %1558 }
 0xd13   :  { %866 = vrot.lane.b32.xlu1 %v1559_v14, %s1603_s3  ;;  %v872_v16 = vmul.f32 %v1559_v14, %v764_v58  ;;  %v880_v21 = vrot.slane %v1559_v14, 2 }
 0xd85   :  { %v867_v17 = vpop.permute.xlu1 %866 }
 0xd86   :  { %v868_v23 = vrot.slane %v867_v17, 2  ;;  %v1155_v17 = vld [vmem:[%s1983_s4 + $0x18] sm:$0xff] }
 0xd88   :  { %v870_v24 = vmul.f32 2.0, %v868_v23  ;;  %v1156_v23 = vld [vmem:[%s1983_s4 + $0x20] sm:$0xff] }
 0xd8a   :  { %v1331_v15 = vadd.f32 -1.0, %v870_v24 }
 0xd8c   :  { %v873_v27 = vmul.f32 %v1559_v14, %v1331_v15  ;;  %v1154_v14 = vld [vmem:[%s1983_s4 + $0x10] sm:$0xff]  ;;  %v1157_v15 = vld [vmem:[%s1983_s4 + $0x28] sm:$0xff] }
 0xd8d   :  { %v1508_v24 = vpack.c.bf16 %v1155_v17, %v1154_v14 }
 0xd8e   :  { %875 = vrot.lane.b32.xlu0 %v873_v27, %s1603_s3  ;;  %v1512_v27 = vpack.c.bf16 %v1157_v15, %v1156_v23 }
 0xe00   :  { %v876_v18 = vpop.permute.xlu0 %875 }
 0xe01   :  { %v878_v19 = vadd.f32 %v876_v18, %v872_v16  ;;  %v1158_v16 = vld [vmem:[%s1983_s4 + $0x30] sm:$0xff]  ;;  %v1159_v18 = vld [vmem:[%s1983_s4 + $0x38] sm:$0xff] }
 0xe03   :  { %1560 = vtanh.f32 %v878_v19 }
 0xe0d   :  { %v1561_v20 = vpop.eup %1560 }
 0xe0e   :  { %883 = vrot.lane.b32.xlu1 %v1561_v20, %s1603_s3 }
 0xe80   :  { %v884_v22 = vpop.permute.xlu1 %883 }
 0xe81   :  { %v886_v25 = vmul.f32 %v884_v22, %v880_v21 }
 0xe83   :  { %v1126_v26 = vsel %vm1117_vm2, %v1788_v1, %v886_v25  ;;  %v1135_v29 = vsel %vm1117_vm2, %v886_v25, %v1788_v1  ;;  %1332 = vmatmul.mubr.msk.f32.vlgmr.msra.gmra.mrb[6].mxu1 %vm202_vm1, %v886_v25  ;;  %v175_v1 = vrot.slane %v161_v10, %v1730_v44 }
 0xe84   :  { %1339 = vst.msk [vmem:[%s1984_s5 + $0x4] sm:$0x3] %vm1121_vm3, %v1126_v26  ;;  %1342 = vst.msk [vmem:[%s1984_s5 + $0xa] sm:$0x3] %vm1121_vm3, %v1135_v29  ;;  %1507 = vmatpush3.bf16.msra.mxu1 %v1504_v9 }
 0xe85   :  { %v177_v57 = vcombine.high %v175_v1, %v175_v1  ;;  %1509 = vmatprep.subr.bf16.mxu1 %v1508_v24 }
 0xe88   :  { %1511 = vmatpush3.bf16.msra.mxu1 %v1508_v24 }
 0xe89   :  { %1513 = vmatprep.subr.bf16.mxu1 %v1512_v27 }
 0xe8b   :  { %v1146_v60 = vld [vmem:[%s1984_s5 + $0x4] sm:$0x3] }
 0xe8c   :  { %1515 = vmatpush3.bf16.msra.mxu1 %v1512_v27 }
 0xf56   :  { %v956_v4 = vpop.f32.mrb[6].mxu1 }
 0xf57   :  { %v958_v30 = vpop.f32.mrb[7].mxu1 }
 0xf58   :  { %v963_v31 = vcombine.low %v956_v4, %v958_v30  ;;  %v1147_v30 = vld [vmem:[%s1984_s5 + $0x6] sm:$0x3] }
 0xf5a   :  { %v970_v32 = vrot.slane %v963_v31, %v1730_v44  ;;  %v1148_v31 = vld [vmem:[%s1984_s5 + $0x8] sm:$0x3] }
 0xf5c   :  { %v972_v33 = vadd.f32 %v970_v32, %v175_v1  ;;  %v1169_v32 = vcombine.low %v1146_v60, %v1147_v30 }
 0xf5e   :  { %v1333_v34 = vmul.f32 -1.442695, %v972_v33 }
 0xf60   :  { %1562 = vpow2.f32 %v1333_v34 }
 0xf6a   :  { %v1563_v35 = vpop.eup %1562 }
 0xf6b   :  { %v976_v37 = vadd.f32 1.0, %v1563_v35 }
 0xf6d   :  { %1564 = vrcp.f32 %v976_v37 }
 0xf77   :  { %v1565_v38 = vpop.eup %1564 }
 0xf78   :  { %980 = vrot.lane.b32.xlu0 %v1565_v38, %s1603_s3  ;;  %v986_v3 = vmul.f32 %v1565_v38, %v878_v19  ;;  %v994_v49 = vrot.slane %v1565_v38, 2  ;;  %v1516_v19 = vpack.c.bf16 %v1159_v18, %v1158_v16 }
 0xf7a   :  { %1517 = vmatprep.subr.bf16.mxu1 %v1516_v19 }
 0xf7b   :  { %1519 = vmatpush3.bf16.msra.mxu1 %v1516_v19 }
 0xfea   :  { %v981_v39 = vpop.permute.xlu0 %980 }
 0xfeb   :  { %v982_v41 = vrot.slane %v981_v39, 2 }
 0xfed   :  { %v984_v43 = vmul.f32 2.0, %v982_v41 }
 0xfef   :  { %v1334_v46 = vadd.f32 -1.0, %v984_v43  ;;  %v1183_v43 = vrot.slane %v1169_v32, %v1730_v44 }
 0xff1   :  { %v987_v47 = vmul.f32 %v1565_v38, %v1334_v46 }
 0xff3   :  { %989 = vrot.lane.b32.xlu1 %v987_v47, %s1603_s3 }
0x1065   :  { %v990_v6 = vpop.permute.xlu1 %989 }
0x1066   :  { %v992_v10 = vadd.f32 %v990_v6, %v986_v3 }
0x1068   :  { %1566 = vtanh.f32 %v992_v10 }
0x1072   :  { %v1567_v48 = vpop.eup %1566 }
0x1073   :  { %997 = vrot.lane.b32.xlu0 %v1567_v48, %s1603_s3 }
0x10e5   :  { %v998_v50 = vpop.permute.xlu0 %997 }
0x10e6   :  { %v1000_v51 = vmul.f32 %v998_v50, %v994_v49 }
0x10e8   :  { %v1123_v52 = vsel %vm1117_vm2, %v1767_v45, %v1000_v51  ;;  %v1138_v53 = vsel %vm1117_vm2, %v1000_v51, %v1767_v45  ;;  %1335 = vmatmul.mubr.msk.f32.vlgmr.msra.gmra.mrb[10].mxu0 %vm202_vm1, %v1000_v51 }
0x10e9   :  { %1338 = vst.msk [vmem:[%s1984_s5 + $0x2] sm:$0x3] %vm1121_vm3, %v1123_v52  ;;  %1343 = vst.msk [vmem:[%s1984_s5 + $0xc] sm:$0x3] %vm1121_vm3, %v1138_v53 }
0x10f0   :  { %v1145_v1 = vld [vmem:[%s1984_s5 + $0x2] sm:$0x3]  ;;  %v1150_v35 = vld [vmem:[%s1984_s5 + $0xc] sm:$0x3] }
0x11bb   :  { %v1070_v54 = vpop.f32.mrb[10].mxu0 }
0x11bc   :  { %v1072_v55 = vpop.f32.mrb[11].mxu0 }
0x11bd   :  { %v1077_v56 = vcombine.low %v1070_v54, %v1072_v55 }
0x11bf   :  { %v1084_v7 = vrot.slane %v1077_v56, %v1730_v44 }
0x11c1   :  { %v1086_v58 = vadd.f32 %v1084_v7, %v177_v57 }
0x11c3   :  { %v1336_v45 = vmul.f32 -1.442695, %v1086_v58 }
0x11c5   :  { %1568 = vpow2.f32 %v1336_v45 }
0x11cf   :  { %v1569_v59 = vpop.eup %1568 }
0x11d0   :  { %v1090_v36 = vadd.f32 1.0, %v1569_v59 }
0x11d2   :  { %1570 = vrcp.f32 %v1090_v36 }
0x11dc   :  { %v1571_v40 = vpop.eup %1570 }
0x11dd   :  { %1094 = vrot.lane.b32.xlu1 %v1571_v40, %s1603_s3  ;;  %v1100_v2 = vmul.f32 %v1571_v40, %v992_v10  ;;  %v1108_v22 = vrot.slane %v1571_v40, 2 }
0x124f   :  { %v1095_v42 = vpop.permute.xlu1 %1094 }
0x1250   :  { %v1096_v61 = vrot.slane %v1095_v42, 2 }
0x1252   :  { %v1098_v62 = vmul.f32 2.0, %v1096_v61 }
0x1254   :  { %v1337_v28 = vadd.f32 -1.0, %v1098_v62 }
0x1256   :  { %v1101_v63 = vmul.f32 %v1571_v40, %v1337_v28 }
0x1258   :  { %1103 = vrot.lane.b32.xlu0 %v1101_v63, %s1603_s3 }
0x12ca   :  { %v1104_v5 = vpop.permute.xlu0 %1103 }
0x12cb   :  { %v1106_v0 = vadd.f32 %v1104_v5, %v1100_v2 }
0x12cd   :  { %1572 = vtanh.f32 %v1106_v0  ;;  %v1291_v12 = vrot.slane %v1106_v0, %v1730_v44 }
0x12cf   :  { %1292 = vrot.lane.b32.xlu0 %v1291_v12, %s1603_s3 }
0x12d7   :  { %v1573_v20 = vpop.eup %1572 }
0x12d8   :  { %1111 = vrot.lane.b32.xlu1 %v1573_v20, %s1603_s3 }
0x1341   :  { %v1293_v21 = vpop.permute.xlu0 %1292 }
0x1342   :  { %1295 = vst.msk [vmem:[%s1987_s8] sm:$0x3] %vm1121_vm3, %v1293_v21 }
0x134a   :  { %v1112_v25 = vpop.permute.xlu1 %1111 }
0x134b   :  { %v1114_v26 = vmul.f32 %v1112_v25, %v1108_v22 }
0x134d   :  { %v1120_v29 = vsel %vm1117_vm2, %v1750_v13, %v1114_v26  ;;  %v1141_v4 = vsel %vm1117_vm2, %v1114_v26, %v1750_v13  ;;  %1283 = vst.msk [vmem:[%s1986_s7] sm:$0x3] %vm1121_vm3, %v1114_v26  ;;  %v1149_v13 = vld [vmem:[%s1984_s5 + $0xa] sm:$0x3] }
0x134e   :  { %1122 = vst.msk [vmem:[%s1984_s5] sm:$0x3] %vm1121_vm3, %v1120_v29  ;;  %1344 = vst.msk [vmem:[%s1984_s5 + $0xe] sm:$0x3] %vm1121_vm3, %v1141_v4  ;;  %v1185_v33 = vcombine.low %v1148_v31, %v1149_v13 }
0x1350   :  { %v1193_v46 = vrot.slane %v1185_v33, %v1730_v44 }
0x1355   :  { %v1144_v34 = vld [vmem:[%s1984_s5] sm:$0x3]  ;;  %v1151_v37 = vld [vmem:[%s1984_s5 + $0xe] sm:$0x3] }
0x1356   :  { %v1168_v38 = vcombine.low %v1144_v34, %v1145_v1  ;;  %v1186_v39 = vcombine.low %v1150_v35, %v1151_v37 }
0x1358   :  { %v1176_v41 = vrot.slane %v1168_v38, %v1730_v44  ;;  %v1200_v47 = vrot.slane %v1186_v39, %v1730_v44 }
0x135a   :  { %v1184_v3 = vcombine.low %v1176_v41, %v1183_v43  ;;  %v1201_v6 = vcombine.low %v1193_v46, %v1200_v47 }
0x135c   :  { %1373 = vmatprep.mubr.msk.f32.mxu1 %vm202_vm1, %v1184_v3 }
0x135d   :  { %1374 = vmatmul.mubr.msk.f32.vlgmr.msra.gmra.mrb[8].mxu1 %vm202_vm1, %v1201_v6 }
0x1430   :  { %v1375_v10 = vpop.f32.mrb[8].mxu1 }
0x1431   :  { %1282 = vst.msk [vmem:[%s1985_s6 + $0x8] sm:$0xff] %vm202_vm1, %v1375_v10  ;;  %v1272_v48 = vpop.f32.mrb[9].mxu1 }
0x1432   :  { %1281 = vst.msk [vmem:[%s1985_s6] sm:$0xff] %vm202_vm1, %v1272_v48 }
0x1433   :  { %1312 = vsyncpa [#allocation3], 1 }

</bundles_post_ra>
